<compile_context>
chip_gen: v7x
topology: tpu7x:2x2x1
jax: 0.10.0
libtpu: 0.0.40
codegen_flags: <defaults>
</compile_context>

<pallas_src>
import math

import jax
import jax.numpy as jnp
from jax import lax
from jax.experimental import pallas as pl
from jax.experimental.pallas import tpu as pltpu


_VMEM_BUDGET = 48 << 20  # v7x physical VMEM is 64 MiB/TC; leave headroom.


def _round_up(n, m):
    return ((n + m - 1) // m) * m


def _vmem_bytes(bt, f, h, x_itemsize):
    x_stream = 2 * bt * f * x_itemsize          # double-buffered streamed x tile
    out_stream = 2 * bt * 4                     # double-buffered (1, bt) f32 output
    params = 2 * 4 * (f * h + 2 * h * h + 4 * h + 2)   # resident weights/biases (tiny)
    return x_stream + out_stream + params


def _make_mlp_kernel(chunk, n_chunks):
    """Kernel over one (batch_tile, F) x block; processes `chunk`-wide lane
    sub-chunks so activations stay in vregs even for large batch_tile."""

    def kernel(x_ref,
               w0_ref, b0_ref,
               w1_ref, b1_ref,
               w2_ref, b2_ref,
               w3_ref, b3_ref,
               o_ref):
        # Resident params are tiny (H<=O(100)); load once, reuse per chunk.
        w0 = w0_ref[...]
        b0 = b0_ref[...]
        w1 = w1_ref[...]
        b1 = b1_ref[...]
        w2 = w2_ref[...]
        b2 = b2_ref[...]
        w3 = w3_ref[...].astype(jnp.float32)   # (H, 1), used on the VPU/XLU path
        b3 = b3_ref[...]                        # (1, 1) f32
        wdt = w0.dtype                          # bf16 or f32 MXU operands

        # Static sub-chunk loop (offsets are compile-time constants -> aligned,
        # unmasked slices; equivalent to lax.fori_loop(..., unroll=True)).
        for c in range(n_chunks):
            c0 = c * chunk
            xc = x_ref[c0:c0 + chunk, :].astype(wdt)          # (chunk, F)

            # dense0: contract F-vs-F directly on the native layout
            # (H, F) x (chunk, F) -> (H, chunk); batch on lanes, f32 accum.
            h = lax.dot_general(
                w0, xc,
                dimension_numbers=(((1,), (1,)), ((), ())),
                preferred_element_type=jnp.float32)
            h = jnp.maximum(h + b0, 0.0)

            # dense1 -> relu : (H, H) @ (H, chunk)
            h = jnp.dot(w1, h.astype(wdt), preferred_element_type=jnp.float32)
            h = jnp.maximum(h + b1, 0.0)

            # dense2 -> relu : (H, H) @ (H, chunk)
            h = jnp.dot(w2, h.astype(wdt), preferred_element_type=jnp.float32)
            h = jnp.maximum(h + b2, 0.0)

            # output layer (out_features = 1): VPU multiply + XLU sublane reduce
            # instead of draining a 1-wide MXU result.
            y = jnp.sum(h * w3, axis=0, keepdims=True) + b3   # (1, chunk) f32
            o_ref[:, c0:c0 + chunk] = y.astype(o_ref.dtype)

    return kernel


def regressor_module3_forward(x, params, *, batch_tile=4096):
    """x: (B, n_feature).  params: weights (out,in) (f32 or bf16), biases (out,1) f32,
    last-layer weight stored as (num_units, 1).  Returns (B, 1) f32."""
    B, F = x.shape
    w0, b0 = params["w0"], params["b0"]   # (H, F), (H, 1)
    w1, b1 = params["w1"], params["b1"]   # (H, H), (H, 1)
    w2, b2 = params["w2"], params["b2"]   # (H, H), (H, 1)
    w3, b3 = params["w3"], params["b3"]   # (H, 1), (1, 1)
    H = w0.shape[0]

    # ---- tile sizing ------------------------------------------------------
    # Big tiles amortize the ~0.35us/step pipeline overhead; clamp to the batch
    # and to a v7x-safe VMEM budget.  (On v7x also prefer n_tiles >= 8 so both
    # TensorCores get work when B is large enough.)
    bt = max(128, min(_round_up(batch_tile, 128), _round_up(B, 128)))
    while _vmem_bytes(bt, F, H, x.dtype.itemsize) > _VMEM_BUDGET and bt > 128:
        bt = max(128, (bt // 2 // 128) * 128)
    if bt <= 512:
        chunk = bt
    elif bt % 512 == 0:
        chunk = 512
    elif bt % 256 == 0:
        chunk = 256
    else:
        chunk = 128
    n_chunks = bt // chunk
    n_tiles = pl.cdiv(B, bt)
    Bp = n_tiles * bt

    # Pad the batch only when ragged (no transpose; no pad when B % bt == 0).
    x_in = x if Bp == B else jnp.pad(x, ((0, Bp - B), (0, 0)))

    resident = lambda a: pl.BlockSpec(a.shape, lambda i: (0, 0))

    grid_spec = pltpu.PrefetchScalarGridSpec(
        num_scalar_prefetch=0,
        grid=(n_tiles,),
        in_specs=[
            # Streamed x tile in native (B, F) layout.  If a trace still shows
            # exposed DMA at tile boundaries, add pipeline_mode=pl.Buffered(3)
            # here (only on the x stream).
            pl.BlockSpec((bt, F), lambda i: (i, 0)),
            resident(w0), resident(b0),
            resident(w1), resident(b1),
            resident(w2), resident(b2),
            resident(w3), resident(b3),
        ],
        out_specs=pl.BlockSpec((1, bt), lambda i: (0, i)),   # lane-dense output
    )

    cp_kwargs = dict(dimension_semantics=("parallel",))
    vmem_est = _vmem_bytes(bt, F, H, x.dtype.itemsize)
    if vmem_est > (30 << 20):  # only override when exceeding the default scoped limit
        cp_kwargs["vmem_limit_bytes"] = int(min(vmem_est + (8 << 20),
                                                _VMEM_BUDGET + (8 << 20)))

    out_t = pl.pallas_call(
        _make_mlp_kernel(chunk, n_chunks),
        out_shape=jax.ShapeDtypeStruct((1, Bp), jnp.float32),
        grid_spec=grid_spec,
        compiler_params=pltpu.CompilerParams(**cp_kwargs),
    )(x_in, w0, b0, w1, b1, w2, b2, w3, b3)

    return out_t[0, :B].reshape(B, 1)


def init_params(key, n_feature, num_units, dtype=jnp.bfloat16):
    """Mimics nn.Linear U(-1/sqrt(fan_in), 1/sqrt(fan_in)).
    Weights stored (out_features, in_features) in `dtype` (bf16 = MXU-native);
    biases kept f32 (added after f32 accumulation).  Last layer's weight is a
    (num_units, 1) column for the VPU/XLU reduce path."""
    def linear(k, fan_in, fan_out):
        kw, kb = jax.random.split(k)
        bound = 1.0 / math.sqrt(fan_in)
        w = jax.random.uniform(kw, (fan_out, fan_in), jnp.float32, -bound, bound)
        b = jax.random.uniform(kb, (fan_out, 1), jnp.float32, -bound, bound)
        return w.astype(dtype), b

    k0, k1, k2, k3 = jax.random.split(key, 4)
    w0, b0 = linear(k0, n_feature, num_units)   # dense0
    w1, b1 = linear(k1, num_units, num_units)   # dense1
    w2, b2 = linear(k2, num_units, num_units)   # dense2
    w3, b3 = linear(k3, num_units, 1)           # output
    return dict(w0=w0, b0=b0, w1=w1, b1=b1, w2=w2, b2=b2,
                w3=w3.T, b3=b3)                 # w3 -> (num_units, 1)


def reference_forward(x, p):
    """Pure-JAX f32 reference (weights upcast; exact f32 matmuls)."""
    f32 = lambda a: a.astype(jnp.float32)
    relu = lambda v: jnp.maximum(v, 0.0)
    hi = jax.lax.Precision.HIGHEST
    h = relu(jnp.dot(x, f32(p["w0"]).T, precision=hi) + p["b0"].T)
    h = relu(jnp.dot(h, f32(p["w1"]).T, precision=hi) + p["b1"].T)
    h = relu(jnp.dot(h, f32(p["w2"]).T, precision=hi) + p["b2"].T)
    return jnp.dot(h, f32(p["w3"]), precision=hi) + p["b3"]


if __name__ == "__main__":
    key = jax.random.PRNGKey(0)
    kx, kp = jax.random.split(key)

    n_feature, num_units = 16, 32

    # ---- small f32 check (single ragged tile) -----------------------------
    B = 8
    x = jax.random.normal(kx, (B, n_feature), jnp.float32)
    params_f32 = init_params(kp, n_feature, num_units, dtype=jnp.float32)
    out = jax.block_until_ready(regressor_module3_forward(x, params_f32))
    ref = reference_forward(x, params_f32)
    assert out.shape == (B, 1)
    assert jnp.allclose(out, ref, atol=5e-3, rtol=5e-3), (
        f"f32 mismatch, max abs diff {float(jnp.max(jnp.abs(out - ref)))}")

    # ---- larger bf16 check (multi-tile, in-kernel sub-chunk loop, padding) -
    B2 = 1280
    x2 = jax.random.normal(kx, (B2, n_feature), jnp.float32)
    params_bf16 = init_params(kp, n_feature, num_units, dtype=jnp.bfloat16)
    out2 = jax.block_until_ready(
        regressor_module3_forward(x2, params_bf16, batch_tile=1024))
    ref2 = reference_forward(x2, params_bf16)
    assert out2.shape == (B2, 1)
    assert jnp.allclose(out2, ref2, atol=6e-2, rtol=6e-2), (
        f"bf16 mismatch, max abs diff {float(jnp.max(jnp.abs(out2 - ref2)))}")

    print("KERNEL_OK")
</pallas_src>

<mosaic_0001>
module attributes {stable_mosaic.version = 11 : i64} {
  func.func @kernel(%arg0: i32, %arg1: memref<128x16xf32, #tpu.memory_space<vmem>>, %arg2: memref<32x16xf32, #tpu.memory_space<vmem>>, %arg3: memref<32x1xf32, #tpu.memory_space<vmem>>, %arg4: memref<32x32xf32, #tpu.memory_space<vmem>>, %arg5: memref<32x1xf32, #tpu.memory_space<vmem>>, %arg6: memref<32x32xf32, #tpu.memory_space<vmem>>, %arg7: memref<32x1xf32, #tpu.memory_space<vmem>>, %arg8: memref<32x1xf32, #tpu.memory_space<vmem>>, %arg9: memref<1x1xf32, #tpu.memory_space<vmem>>, %arg10: memref<1x128xf32, #tpu.memory_space<vmem>>) attributes {dimension_semantics = [#tpu.dimension_semantics<parallel>], iteration_bounds = array<i64: 1>, scalar_prefetch = 0 : i64, scratch_operands = 0 : i64, tpu.core_type = #tpu.core_type<tc>, window_params = [{transform_indices = @transform_0, window_bounds = array<i64: 128, 16>}, {pipeline_mode = #tpu.pipeline_mode<synchronous>, transform_indices = @transform_1, window_bounds = array<i64: 32, 16>}, {pipeline_mode = #tpu.pipeline_mode<synchronous>, transform_indices = @transform_2, window_bounds = array<i64: 32, 1>}, {pipeline_mode = #tpu.pipeline_mode<synchronous>, transform_indices = @transform_3, window_bounds = array<i64: 32, 32>}, {pipeline_mode = #tpu.pipeline_mode<synchronous>, transform_indices = @transform_4, window_bounds = array<i64: 32, 1>}, {pipeline_mode = #tpu.pipeline_mode<synchronous>, transform_indices = @transform_5, window_bounds = array<i64: 32, 32>}, {pipeline_mode = #tpu.pipeline_mode<synchronous>, transform_indices = @transform_6, window_bounds = array<i64: 32, 1>}, {pipeline_mode = #tpu.pipeline_mode<synchronous>, transform_indices = @transform_7, window_bounds = array<i64: 32, 1>}, {pipeline_mode = #tpu.pipeline_mode<synchronous>, transform_indices = @transform_8, window_bounds = array<i64: 1, 1>}, {transform_indices = @transform_9, window_bounds = array<i64: 1, 128>}]} {
    %c0 = arith.constant 0 : index
    %c0_0 = arith.constant 0 : index
    %0 = vector.load %arg2[%c0, %c0_0] : memref<32x16xf32, #tpu.memory_space<vmem>>, vector<32x16xf32>
    %c0_1 = arith.constant 0 : index
    %c0_2 = arith.constant 0 : index
    %1 = vector.load %arg3[%c0_1, %c0_2] : memref<32x1xf32, #tpu.memory_space<vmem>>, vector<32x1xf32>
    %c0_3 = arith.constant 0 : index
    %c0_4 = arith.constant 0 : index
    %2 = vector.load %arg4[%c0_3, %c0_4] : memref<32x32xf32, #tpu.memory_space<vmem>>, vector<32x32xf32>
    %c0_5 = arith.constant 0 : index
    %c0_6 = arith.constant 0 : index
    %3 = vector.load %arg5[%c0_5, %c0_6] : memref<32x1xf32, #tpu.memory_space<vmem>>, vector<32x1xf32>
    %c0_7 = arith.constant 0 : index
    %c0_8 = arith.constant 0 : index
    %4 = vector.load %arg6[%c0_7, %c0_8] : memref<32x32xf32, #tpu.memory_space<vmem>>, vector<32x32xf32>
    %c0_9 = arith.constant 0 : index
    %c0_10 = arith.constant 0 : index
    %5 = vector.load %arg7[%c0_9, %c0_10] : memref<32x1xf32, #tpu.memory_space<vmem>>, vector<32x1xf32>
    %c0_11 = arith.constant 0 : index
    %c0_12 = arith.constant 0 : index
    %6 = vector.load %arg8[%c0_11, %c0_12] : memref<32x1xf32, #tpu.memory_space<vmem>>, vector<32x1xf32>
    %c0_13 = arith.constant 0 : index
    %c0_14 = arith.constant 0 : index
    %7 = vector.load %arg9[%c0_13, %c0_14] : memref<1x1xf32, #tpu.memory_space<vmem>>, vector<1x1xf32>
    %c0_15 = arith.constant 0 : index
    %c0_16 = arith.constant 0 : index
    %8 = vector.load %arg1[%c0_15, %c0_16] : memref<128x16xf32, #tpu.memory_space<vmem>>, vector<128x16xf32>
    %cst = arith.constant dense<0.000000e+00> : vector<32x128xf32>
    %9 = tpu.matmul %0, %8, %cst {dimension_numbers = #tpu.dot_dimension_numbers<[1], [1], [0], [0], [0, 0, 1, 0], [], []>} : vector<32x16xf32>, vector<128x16xf32>, vector<32x128xf32> -> vector<32x128xf32>
    %10 = vector.broadcast %1 : vector<32x1xf32> to vector<32x128xf32>
    %11 = arith.addf %9, %10 : vector<32x128xf32>
    %cst_17 = arith.constant 0.000000e+00 : f32
    %12 = vector.broadcast %cst_17 : f32 to vector<32x128xf32>
    %13 = arith.maximumf %11, %12 : vector<32x128xf32>
    %cst_18 = arith.constant dense<0.000000e+00> : vector<32x128xf32>
    %14 = tpu.matmul %2, %13, %cst_18 {dimension_numbers = #tpu.dot_dimension_numbers<[1], [0], [0], [1], [0, 0, 1, 1], [], []>} : vector<32x32xf32>, vector<32x128xf32>, vector<32x128xf32> -> vector<32x128xf32>
    %15 = vector.broadcast %3 : vector<32x1xf32> to vector<32x128xf32>
    %16 = arith.addf %14, %15 : vector<32x128xf32>
    %cst_19 = arith.constant 0.000000e+00 : f32
    %17 = vector.broadcast %cst_19 : f32 to vector<32x128xf32>
    %18 = arith.maximumf %16, %17 : vector<32x128xf32>
    %cst_20 = arith.constant dense<0.000000e+00> : vector<32x128xf32>
    %19 = tpu.matmul %4, %18, %cst_20 {dimension_numbers = #tpu.dot_dimension_numbers<[1], [0], [0], [1], [0, 0, 1, 1], [], []>} : vector<32x32xf32>, vector<32x128xf32>, vector<32x128xf32> -> vector<32x128xf32>
    %20 = vector.broadcast %5 : vector<32x1xf32> to vector<32x128xf32>
    %21 = arith.addf %19, %20 : vector<32x128xf32>
    %cst_21 = arith.constant 0.000000e+00 : f32
    %22 = vector.broadcast %cst_21 : f32 to vector<32x128xf32>
    %23 = arith.maximumf %21, %22 : vector<32x128xf32>
    %24 = vector.broadcast %6 : vector<32x1xf32> to vector<32x128xf32>
    %25 = arith.mulf %23, %24 : vector<32x128xf32>
    %cst_22 = arith.constant dense<0.000000e+00> : vector<128xf32>
    %26 = vector.multi_reduction <add>, %25, %cst_22 [0] : vector<32x128xf32> to vector<128xf32>
    %27 = vector.shape_cast %26 : vector<128xf32> to vector<1x128xf32>
    %28 = vector.broadcast %7 : vector<1x1xf32> to vector<1x128xf32>
    %29 = arith.addf %27, %28 : vector<1x128xf32>
    %c0_23 = arith.constant 0 : index
    %c0_24 = arith.constant 0 : index
    %30 = vector.load %arg10[%c0_23, %c0_24] : memref<1x128xf32, #tpu.memory_space<vmem>>, vector<1x128xf32>
    tpu.vector_store %arg10[%c0_23, %c0_24], %29 {strides = array<i32>} : memref<1x128xf32, #tpu.memory_space<vmem>>, vector<1x128xf32>,
    return
  }
  func.func @transform_0(%arg0: i32) -> (i32, i32) {
    %c0_i32 = arith.constant 0 : i32
    %c0_i32_0 = arith.constant 0 : i32
    return %arg0, %c0_i32 : i32, i32
  }
  func.func @transform_1(%arg0: i32) -> (i32, i32) {
    %c0_i32 = arith.constant 0 : i32
    %c0_i32_0 = arith.constant 0 : i32
    %c0_i32_1 = arith.constant 0 : i32
    return %c0_i32, %c0_i32_0 : i32, i32
  }
  func.func @transform_2(%arg0: i32) -> (i32, i32) {
    %c0_i32 = arith.constant 0 : i32
    %c0_i32_0 = arith.constant 0 : i32
    %c0_i32_1 = arith.constant 0 : i32
    return %c0_i32, %c0_i32_0 : i32, i32
  }
  func.func @transform_3(%arg0: i32) -> (i32, i32) {
    %c0_i32 = arith.constant 0 : i32
    %c0_i32_0 = arith.constant 0 : i32
    %c0_i32_1 = arith.constant 0 : i32
    return %c0_i32, %c0_i32_0 : i32, i32
  }
  func.func @transform_4(%arg0: i32) -> (i32, i32) {
    %c0_i32 = arith.constant 0 : i32
    %c0_i32_0 = arith.constant 0 : i32
    %c0_i32_1 = arith.constant 0 : i32
    return %c0_i32, %c0_i32_0 : i32, i32
  }
  func.func @transform_5(%arg0: i32) -> (i32, i32) {
    %c0_i32 = arith.constant 0 : i32
    %c0_i32_0 = arith.constant 0 : i32
    %c0_i32_1 = arith.constant 0 : i32
    return %c0_i32, %c0_i32_0 : i32, i32
  }
  func.func @transform_6(%arg0: i32) -> (i32, i32) {
    %c0_i32 = arith.constant 0 : i32
    %c0_i32_0 = arith.constant 0 : i32
    %c0_i32_1 = arith.constant 0 : i32
    return %c0_i32, %c0_i32_0 : i32, i32
  }
  func.func @transform_7(%arg0: i32) -> (i32, i32) {
    %c0_i32 = arith.constant 0 : i32
    %c0_i32_0 = arith.constant 0 : i32
    %c0_i32_1 = arith.constant 0 : i32
    return %c0_i32, %c0_i32_0 : i32, i32
  }
  func.func @transform_8(%arg0: i32) -> (i32, i32) {
    %c0_i32 = arith.constant 0 : i32
    %c0_i32_0 = arith.constant 0 : i32
    %c0_i32_1 = arith.constant 0 : i32
    return %c0_i32, %c0_i32_0 : i32, i32
  }
  func.func @transform_9(%arg0: i32) -> (i32, i32) {
    %c0_i32 = arith.constant 0 : i32
    %c0_i32_0 = arith.constant 0 : i32
    return %c0_i32, %arg0 : i32, i32
  }
}

</mosaic_0001>

<bundles_post_ra>
// kernel: tpu_custom_call.1
= control target key start
LH: loop header
LB: loop body
LE: loop exit
PB: predicated region body
PF: predicated region fallthrough
CT: control target
= control target key end

     0   :  { %s1022_s0 = inlined_call_operand.vmem [shape: f32[128,16], index: 0, kind: input, shape index: {}]   ;;  %s1023_s1 = inlined_call_operand.vmem [shape: f32[32,16], index: 1, kind: input, shape index: {}]   ;;  %s1024_s2 = inlined_call_operand.vmem [shape: f32[32,1], index: 2, kind: input, shape index: {}]   ;;  %s1025_s3 = inlined_call_operand.vmem [shape: f32[32,32], index: 3, kind: input, shape index: {}]   ;;  %s1026_s4 = inlined_call_operand.vmem [shape: f32[32,1], index: 4, kind: input, shape index: {}]   ;;  %s1027_s5 = inlined_call_operand.vmem [shape: f32[32,32], index: 5, kind: input, shape index: {}]   ;;  %s1028_s6 = inlined_call_operand.vmem [shape: f32[32,1], index: 6, kind: input, shape index: {}]   ;;  %s1029_s7 = inlined_call_operand.vmem [shape: f32[32,1], index: 7, kind: input, shape index: {}]   ;;  %s1030_s8 = inlined_call_operand.<no memory space> [shape: f32[1,1], index: 8, kind: input, shape index: {}]   ;;  %s1031_s9 = inlined_call_operand.hbm [shape: f32[1,128], index: 9, kind: output, shape index: {}]  }
   0x1   :  { %v14_v0 = vstv %s1030_s8 }
   0x2   :  { %15 = vst [vmem:[#allocation2] sm:$0x1] %v14_v0 }
   0x3   :  { %v64_v1 = vld [vmem:[%s1022_s0] sm:$0xff]  ;;  %v65_v2 = vld [vmem:[%s1022_s0 + $0x8] sm:$0xff]  ;;  %vm100_vm0 = vcmask 130048   ;;  %v66_v3 = vld [vmem:[%s1022_s0 + $0x10] sm:$0xff]  ;;  %v773_v7 = vmov 0  }
   0x4   :  { %v681_v4 = vpack.c.bf16 %v65_v2, %v64_v1  ;;  %vm839_vm1 = vmpackc.low %vm100_vm0, %vm100_vm0  ;;  %v67_v6 = vld [vmem:[%s1022_s0 + $0x18] sm:$0xff]  ;;  %747 = vset.pattern.permute.xlu0 %v773_v7  ;;  %748 = vset.pattern.permute.xlu1 %v773_v7  ;;  %v35_v9 = vld [vmem:[%s1023_s1] sm:$0xff] }
   0x5   :  { %v687_v8 = vpack.c.bf16 %v67_v6, %v66_v3  ;;  %v68_v10 = vld [vmem:[%s1022_s0 + $0x20] sm:$0xff]  ;;  %v69_v11 = vld [vmem:[%s1022_s0 + $0x28] sm:$0xff]  ;;  %647 = vmatprep.mubr.msk.f32.mxu0 %vm100_vm0, %v35_v9  ;;  %v41_v13 = vld [vmem:[%s1024_s2 + $0x10] sm:$0xff] }
   0x6   :  { %683 = vmatprep.subr.msk.bf16.mxu0 %vm839_vm1, %v681_v4  ;;  %v39_v12 = vld [vmem:[%s1024_s2] sm:$0xff]  ;;  %92 = vperm.xlu1 %748, %v41_v13   ;;  %v693_v14 = vpack.c.bf16 %v69_v11, %v68_v10  ;;  %v40_v15 = vld [vmem:[%s1024_s2 + $0x8] sm:$0xff]  ;;  %v42_v16 = vld [vmem:[%s1024_s2 + $0x18] sm:$0xff] }
   0x7   :  { %686 = vmatpush3.bf16.xpose.msk.msra.mxu0 %vm839_vm1, %v681_v4  ;;  %82 = vperm.xlu0 %747, %v39_v12  }
   0x8   :  { %689 = vmatprep.subr.msk.bf16.mxu0 %vm839_vm1, %v687_v8 }
   0xb   :  { %87 = vperm.xlu0 %747, %v40_v15  }
   0xf   :  { %692 = vmatpush3.bf16.xpose.msk.msra.mxu0 %vm839_vm1, %v687_v8 }
  0x10   :  { %16 = vsyncpa [#allocation4], 0  ;;  %695 = vmatprep.subr.msk.bf16.mxu0 %vm839_vm1, %v693_v14  ;;  %v47_v17 = vld [vmem:[%s1026_s4] sm:$0xff]  ;;  %97 = vperm.xlu1 %748, %v42_v16   ;;  %v70_v18 = vld [vmem:[%s1022_s0 + $0x30] sm:$0xff]  ;;  %vm270_vm2 = vcmask 261120  }
  0x11   :  { %v71_v19 = vld [vmem:[%s1022_s0 + $0x38] sm:$0xff]  ;;  %v48_v20 = vld [vmem:[%s1026_s4 + $0x8] sm:$0xff]  ;;  %252 = vperm.xlu0 %747, %v47_v17   ;;  %v49_v22 = vld [vmem:[%s1026_s4 + $0x10] sm:$0xff] }
  0x12   :  { %v699_v21 = vpack.c.bf16 %v71_v19, %v70_v18  ;;  %v50_v23 = vld [vmem:[%s1026_s4 + $0x18] sm:$0xff]  ;;  %v55_v24 = vld [vmem:[%s1028_s6] sm:$0xff]  ;;  %v73_v26 = vld [vmem:[%s1022_s0 + $0x48] sm:$0xff] }
  0x13   :  { %v72_v25 = vld [vmem:[%s1022_s0 + $0x40] sm:$0xff]  ;;  %v56_v27 = vld [vmem:[%s1028_s6 + $0x8] sm:$0xff]  ;;  %v57_v29 = vld [vmem:[%s1028_s6 + $0x10] sm:$0xff] }
  0x14   :  { %257 = vperm.xlu1 %748, %v48_v20   ;;  %v705_v28 = vpack.c.bf16 %v73_v26, %v72_v25  ;;  %v58_v30 = vld [vmem:[%s1028_s6 + $0x18] sm:$0xff]  ;;  %v59_v31 = vld [vmem:[%s1029_s7] sm:$0xff]  ;;  %v74_v32 = vld [vmem:[%s1022_s0 + $0x50] sm:$0xff] }
  0x15   :  { %262 = vperm.xlu0 %747, %v49_v22   ;;  %v75_v33 = vld [vmem:[%s1022_s0 + $0x58] sm:$0xff]  ;;  %v60_v34 = vld [vmem:[%s1029_s7 + $0x8] sm:$0xff]  ;;  %v61_v36 = vld [vmem:[%s1029_s7 + $0x10] sm:$0xff] }
  0x16   :  { %v711_v35 = vpack.c.bf16 %v75_v33, %v74_v32  ;;  %v62_v37 = vld [vmem:[%s1029_s7 + $0x18] sm:$0xff]  ;;  %v63_v38 = vld [vmem:[#allocation2] sm:$0x1]  ;;  %v77_v40 = vld [vmem:[%s1022_s0 + $0x68] sm:$0xff] }
  0x17   :  { %698 = vmatpush3.bf16.xpose.msk.msra.mxu0 %vm839_vm1, %v693_v14  ;;  %v76_v39 = vld [vmem:[%s1022_s0 + $0x60] sm:$0xff]  ;;  %v78_v42 = vld [vmem:[%s1022_s0 + $0x70] sm:$0xff]  ;;  %v79_v43 = vld [vmem:[%s1022_s0 + $0x78] sm:$0xff] }
  0x18   :  { %701 = vmatprep.subr.msk.bf16.mxu0 %vm839_vm1, %v699_v21  ;;  %267 = vperm.xlu1 %748, %v50_v23   ;;  %v717_v41 = vpack.c.bf16 %v77_v40, %v76_v39  ;;  %v723_v44 = vpack.c.bf16 %v79_v43, %v78_v42  ;;  %v36_v45 = vld [vmem:[%s1023_s1 + $0x8] sm:$0xff]  ;;  %v37_v46 = vld [vmem:[%s1023_s1 + $0x10] sm:$0xff]  ;;  %v38_v47 = vld [vmem:[%s1023_s1 + $0x18] sm:$0xff] }
  0x19   :  { %374 = vperm.xlu0 %747, %v55_v24   ;;  %v43_v48 = vld [vmem:[%s1025_s3] sm:$0xff]  ;;  %v44_v3 = vld [vmem:[%s1025_s3 + $0x8] sm:$0xff]  ;;  %v45_v4 = vld [vmem:[%s1025_s3 + $0x10] sm:$0xff] }
  0x1a   :  { %661 = vmatprep.mubr.msk.f32.mxu1 %vm270_vm2, %v43_v48  ;;  %v46_v5 = vld [vmem:[%s1025_s3 + $0x18] sm:$0xff]  ;;  %v51_v6 = vld [vmem:[%s1027_s5] sm:$0xff]  ;;  %v52_v25 = vld [vmem:[%s1027_s5 + $0x8] sm:$0xff] }
  0x1b   :  { %v53_v26 = vld [vmem:[%s1027_s5 + $0x10] sm:$0xff] }
  0x1c   :  { %379 = vperm.xlu1 %748, %v56_v27   ;;  %v54_v27 = vld [vmem:[%s1027_s5 + $0x18] sm:$0xff]  ;;  %s774_s5 = smov [#allocation3]  }
  0x1d   :  { %384 = vperm.xlu0 %747, %v57_v29   ;;  %s543_s21 = sshll.u32 %s774_s5, 4  ;;  %s544_s21 = int_to_ptr.vmem [resolvable:$true] %s543_s21 }
  0x1e   :  { %s749_s22 = scalar_lea.vmem %s544_s21, 16  ;;  %s753_s23 = scalar_lea.vmem %s544_s21, 32 }
  0x1f   :  { %704 = vmatpush3.bf16.xpose.msk.msra.mxu0 %vm839_vm1, %v699_v21  ;;  %p750_p0 = scmp.ne.s32.totalorder %s544_s21, %s749_s22  ;;  %p754_p1 = scmp.lt.s32.totalorder %s544_s21, %s544_s21 }
  0x20   :  { %707 = vmatprep.subr.msk.bf16.mxu0 %vm839_vm1, %v705_v28  ;;  %389 = vperm.xlu1 %748, %v58_v30   ;;  %p755_p2 = scmp.lt.s32.totalorder %s753_s23, %s749_s22 }
  0x21   :  { %495 = vperm.xlu0 %747, %v59_v31  }
  0x22   :  { %p756_p3 = por %p755_p2, %p754_p1 }
  0x24   :  { %500 = vperm.xlu1 %748, %v60_v34   ;;  %p757_p4 = pnand %p756_p3, %p750_p0 }
  0x25   :  { %505 = vperm.xlu0 %747, %v61_v36  }
  0x27   :  { %710 = vmatpush3.bf16.xpose.msk.msra.mxu0 %vm839_vm1, %v705_v28 }
  0x28   :  { %713 = vmatprep.subr.msk.bf16.mxu0 %vm839_vm1, %v711_v35  ;;  %510 = vperm.xlu1 %748, %v62_v37  }
  0x29   :  { %528 = vperm.xlu0 %747, %v63_v38  }
  0x2f   :  { %716 = vmatpush3.bf16.xpose.msk.msra.mxu0 %vm839_vm1, %v711_v35 }
  0x30   :  { %719 = vmatprep.subr.msk.bf16.mxu0 %vm839_vm1, %v717_v41 }
  0x37   :  { %722 = vmatpush3.bf16.xpose.msk.msra.mxu0 %vm839_vm1, %v717_v41 }
  0x38   :  { %725 = vmatprep.subr.msk.bf16.mxu0 %vm839_vm1, %v723_v44 }
  0x3f   :  { %728 = vmatpush3.bf16.xpose.msk.msra.mxu0 %vm839_vm1, %v723_v44 }
  0x46   :  { %648 = vmatmul.mubr.msk.f32.vlgmr.msra.gmra.mrb[0].mxu0 %vm100_vm0, %v36_v45 }
  0x47   :  { %650 = vmatprep.mubr.msk.f32.mxu0 %vm100_vm0, %v37_v46 }
  0x4a   :  { %651 = vmatmul.mubr.msk.f32.gmra.mrb[2].mxu0 %vm100_vm0, %v38_v47 }
  0x85   :  { %v93_v50 = vpop.permute.xlu1 %92 }
  0x86   :  { %v83_v49 = vpop.permute.xlu0 %82 }
  0x8a   :  { %v88_v51 = vpop.permute.xlu0 %87 }
  0x8f   :  { %v98_v57 = vpop.permute.xlu1 %97 }
  0x90   :  { %v253_v8 = vpop.permute.xlu0 %252 }
  0x93   :  { %v258_v7 = vpop.permute.xlu1 %257 }
  0x94   :  { %v263_v17 = vpop.permute.xlu0 %262 }
  0x97   :  { %v268_v14 = vpop.permute.xlu1 %267 }
  0x98   :  { %v375_v28 = vpop.permute.xlu0 %374 }
  0x9b   :  { %v380_v29 = vpop.permute.xlu1 %379 }
  0x9c   :  { %v385_v30 = vpop.permute.xlu0 %384 }
  0x9f   :  { %v390_v31 = vpop.permute.xlu1 %389 }
  0xa0   :  { %v496_v36 = vpop.permute.xlu0 %495 }
  0xa3   :  { %v501_v38 = vpop.permute.xlu1 %500 }
 0x119   :  { %v649_v52 = vpop.f32.mrb[0].mxu0 }
 0x11a   :  { %v233_v53 = vadd.f32 %v649_v52, %v88_v51  ;;  %v227_v54 = vpop.f32.mrb[1].mxu0  ;;  %v511_v51 = vpop.permute.xlu1 %510 }
 0x11b   :  { %v228_v55 = vadd.f32 %v227_v54, %v83_v49  ;;  %v506_v49 = vpop.permute.xlu0 %505  ;;  %v531_v54 = vlaneseq }
 0x11c   :  { %v247_v56 = vmax.f32 %v233_v53, 0.0 }
 0x11d   :  { %v246_v58 = vmax.f32 %v228_v55, 0.0  ;;  %v652_v59 = vpop.f32.mrb[2].mxu0 }
 0x11e   :  { %v243_v60 = vadd.f32 %v652_v59, %v98_v57  ;;  %v237_v61 = vpop.f32.mrb[3].mxu0  ;;  %v532_v57 = vshrl.u32 %v531_v54, 7 }
 0x11f   :  { %v238_v62 = vadd.f32 %v237_v61, %v93_v50  ;;  %v729_v63 = vpack.c.bf16 %v247_v56, %v246_v58 }
 0x120   :  { %v249_v0 = vmax.f32 %v243_v60, 0.0  ;;  %v533_v60 = vsub.s32 0, %v532_v57 }
 0x121   :  { %v248_v1 = vmax.f32 %v238_v62, 0.0  ;;  %730 = vmatprep.subr.bf16.mxu1 %v729_v63  ;;  %v529_v62 = vpop.permute.xlu0 %528 }
 0x122   :  { %732 = vmatpush3.bf16.msra.mxu1 %v729_v63 }
 0x123   :  { %v733_v2 = vpack.c.bf16 %v249_v0, %v248_v1  ;;  %v534_v0 = vrot.slane %v529_v62, %v533_v60 }
 0x125   :  { %734 = vmatprep.subr.bf16.mxu1 %v733_v2 }
 0x126   :  { %736 = vmatpush3.bf16.msra.mxu1 %v733_v2 }
 0x129   :  { %662 = vmatmul.mubr.msk.f32.vlgmr.msra.gmra.mrb[0].mxu1 %vm270_vm2, %v44_v3 }
 0x12a   :  { %664 = vmatprep.mubr.msk.f32.mxu1 %vm270_vm2, %v45_v4 }
 0x12d   :  { %665 = vmatmul.mubr.msk.f32.gmra.mrb[2].mxu1 %vm270_vm2, %v46_v5 }
 0x12e   :  { %675 = vmatprep.mubr.msk.f32.mxu1 %vm270_vm2, %v51_v6 }
 0x1fc   :  { %v663_v9 = vpop.f32.mrb[0].mxu1 }
 0x1fd   :  { %v355_v10 = vadd.f32 %v663_v9, %v258_v7  ;;  %v349_v11 = vpop.f32.mrb[1].mxu1 }
 0x1fe   :  { %v350_v12 = vadd.f32 %v349_v11, %v253_v8 }
 0x1ff   :  { %v369_v13 = vmax.f32 %v355_v10, 0.0 }
 0x200   :  { %v368_v15 = vmax.f32 %v350_v12, 0.0  ;;  %v666_v16 = vpop.f32.mrb[2].mxu1 }
 0x201   :  { %v365_v18 = vadd.f32 %v666_v16, %v268_v14  ;;  %v359_v19 = vpop.f32.mrb[3].mxu1 }
 0x202   :  { %v737_v20 = vpack.c.bf16 %v369_v13, %v368_v15  ;;  %v360_v21 = vadd.f32 %v359_v19, %v263_v17 }
 0x203   :  { %v371_v22 = vmax.f32 %v365_v18, 0.0 }
 0x204   :  { %v370_v23 = vmax.f32 %v360_v21, 0.0  ;;  %738 = vmatprep.subr.bf16.mxu1 %v737_v20 }
 0x205   :  { %740 = vmatpush3.bf16.msra.mxu1 %v737_v20 }
 0x206   :  { %v741_v24 = vpack.c.bf16 %v371_v22, %v370_v23 }
 0x208   :  { %742 = vmatprep.subr.bf16.mxu1 %v741_v24 }
 0x209   :  { %744 = vmatpush3.bf16.msra.mxu1 %v741_v24 }
 0x20c   :  { %676 = vmatmul.mubr.msk.f32.vlgmr.msra.gmra.mrb[4].mxu1 %vm270_vm2, %v52_v25 }
 0x20d   :  { %678 = vmatprep.mubr.msk.f32.mxu1 %vm270_vm2, %v53_v26 }
 0x210   :  { %679 = vmatmul.mubr.msk.f32.gmra.mrb[6].mxu1 %vm270_vm2, %v54_v27 }
 0x2df   :  { %v677_v32 = vpop.f32.mrb[4].mxu1 }
 0x2e0   :  { %v476_v33 = vadd.f32 %v677_v32, %v380_v29  ;;  %v470_v34 = vpop.f32.mrb[5].mxu1 }
 0x2e1   :  { %v471_v35 = vadd.f32 %v470_v34, %v375_v28 }
 0x2e2   :  { %v490_v37 = vmax.f32 %v476_v33, 0.0 }
 0x2e3   :  { %v489_v39 = vmax.f32 %v471_v35, 0.0  ;;  %v680_v40 = vpop.f32.mrb[6].mxu1 }
 0x2e4   :  { %v514_v41 = vmul.f32 %v501_v38, %v490_v37  ;;  %v486_v42 = vadd.f32 %v680_v40, %v390_v31  ;;  %v480_v43 = vpop.f32.mrb[7].mxu1 }
 0x2e5   :  { %v513_v44 = vmul.f32 %v496_v36, %v489_v39  ;;  %v481_v45 = vadd.f32 %v480_v43, %v385_v30 }
 0x2e6   :  { %v492_v47 = vmax.f32 %v486_v42, 0.0 }
 0x2e7   :  { %v517_v46 = vadd.f32 %v514_v41, %v513_v44  ;;  %v491_v48 = vmax.f32 %v481_v45, 0.0 }
 0x2e8   :  { %v516_v52 = vmul.f32 %v511_v51, %v492_v47 }
 0x2e9   :  { %v515_v50 = vmul.f32 %v506_v49, %v491_v48 }
 0x2eb   :  { %v518_v53 = vadd.f32 %v517_v46, %v515_v50 }
 0x2ed   :  { %v519_v55 = vadd.f32 %v518_v53, %v516_v52 }
 0x2ef   :  { %v520_v56 = vrot.slane %v519_v55, 4 }
 0x2f1   :  { %v521_v58 = vadd.f32 %v520_v56, %v519_v55 }
 0x2f3   :  { %v522_v59 = vrot.slane %v521_v58, 2 }
 0x2f5   :  { %v523_v61 = vadd.f32 %v522_v59, %v521_v58 }
 0x2f7   :  { %v524_v63 = vrot.slane %v523_v61, 1 }
 0x2f9   :  { %v525_v1 = vadd.f32 %v524_v63, %v523_v61 }
 0x2fb   :  { %v535_v2 = vadd.f32 %v534_v0, %v525_v1 }
 0x2fd   :  { %536 = vst [vmem:[#allocation3] sm:$0x1] %v535_v2 }
 0x2fe   :  { %760 = shalt.err (!%p757_p4)
}
 0x2ff   :  { %s761_s25 = scalar_lea.hbm %s1031_s9, 16 }
 0x300   :  { %p762_p5 = scmp.ne.s32.totalorder %s1031_s9, %s761_s25  ;;  %p765_p6 = scmp.lt.u32.totalorder %s761_s25, %s1031_s9 }
 0x302   :  { %p767_p7 = pnand %p765_p6, %p762_p5 }
 0x304   :  { %770 = shalt.err (!%p767_p7)
}
 0x305   :  { %546 = dma.vmem_to_hbm [thread:$0]  %s544_s21, 16, %s1031_s9, [#allocation4]  }
 0x306   :  { %771 = dma.done.wait [#allocation4], 16  }
 0x307   :  { %772 = vsyncadd [#allocation4], 4294967280 }
 0x308   :  { %550 = vsyncpa [#allocation4], 1 }

</bundles_post_ra>
